<compile_context>
chip_gen: v7x
topology: tpu7x:2x2x1
jax: 0.10.0
libtpu: 0.0.40
codegen_flags: <defaults>
</compile_context>

<pallas_src>
from functools import partial

import jax
import jax.numpy as jnp
from jax.experimental import pallas as pl
from jax.experimental.pallas import tpu as pltpu


def _round_up(x, m):
    return ((x + m - 1) // m) * m


# ----------------------------------------------------------------------------
# Kernel 1: SINR location encoder + residual stack  ->  h (bf16)
# ----------------------------------------------------------------------------
def _sinr_hidden_kernel(enc_ref, w_in_ref, b_in_ref,
                        rw1_ref, rb1_ref, rw2_ref, rb2_ref,
                        h_ref, *, n_layers, input_len):
    x = enc_ref[...]                     # (TB, input_len) f32
    w_in = w_in_ref[...]                 # (input_len, H)  f32
    # Linear(input_len, H): K is tiny (<=24), so use VPU broadcast-FMAs instead
    # of an almost-entirely-padded MXU pass.
    acc = x[:, 0:1] * w_in[0:1, :]
    for k in range(1, input_len):
        acc = acc + x[:, k:k + 1] * w_in[k:k + 1, :]
    h = jnp.maximum(acc + b_in_ref[...], 0.0)

    # Residual blocks (statically unrolled); Dropout = identity (eval).
    for l in range(n_layers):
        t = jnp.dot(h, rw1_ref[l], preferred_element_type=jnp.float32)
        t = jnp.maximum(t + rb1_ref[l], 0.0)
        t = jnp.dot(t, rw2_ref[l], preferred_element_type=jnp.float32)
        t = jnp.maximum(t + rb2_ref[l], 0.0)
        h = h + t

    # Emit bf16 once, so the classifier kernel never re-packs per class tile.
    h_ref[...] = h.astype(jnp.bfloat16)


# ----------------------------------------------------------------------------
# Kernel 2: fused late-fusion classifier
#   out = [h | sent2_enc] @ [wc1; wc2] + (bc1 + bc2)      (bf16 MXU, f32 acc)
# ----------------------------------------------------------------------------
def _classifier_kernel(feat_ref, w_ref, b_ref, out_ref):
    out_ref[...] = (jnp.dot(feat_ref[...], w_ref[...],
                            preferred_element_type=jnp.float32)
                    + b_ref[...])


# ----------------------------------------------------------------------------
# Parameter init / one-time prep
# ----------------------------------------------------------------------------
def init_params(key, input_len=4, hidden_dim=32, layers=4, num_classes=10040,
                sat_dim=256):
    """Deterministic init mimicking PyTorch Linear default (U[-1/sqrt(fan_in), +])."""
    def linear(k, fan_in, fan_out):
        kw, kb = jax.random.split(k)
        bound = 1.0 / jnp.sqrt(fan_in)
        w = jax.random.uniform(kw, (fan_in, fan_out), jnp.float32, -bound, bound)
        b = jax.random.uniform(kb, (fan_out,), jnp.float32, -bound, bound)
        return w, b

    keys = jax.random.split(key, 3 + 2 * layers)
    w_in, b_in = linear(keys[0], input_len, hidden_dim)
    rw1, rb1, rw2, rb2 = [], [], [], []
    for l in range(layers):
        w1, b1 = linear(keys[1 + 2 * l], hidden_dim, hidden_dim)
        w2, b2 = linear(keys[2 + 2 * l], hidden_dim, hidden_dim)
        rw1.append(w1); rb1.append(b1); rw2.append(w2); rb2.append(b2)
    wc1, bc1 = linear(keys[-2], hidden_dim, num_classes)      # SINR classifier
    wc2, bc2 = linear(keys[-1], sat_dim, num_classes)         # sent2_to_classes
    return dict(w_in=w_in, b_in=b_in,
                rw1=jnp.stack(rw1), rb1=jnp.stack(rb1),
                rw2=jnp.stack(rw2), rb2=jnp.stack(rb2),
                wc1=wc1, bc1=bc1, wc2=wc2, bc2=bc2)


def prepare_params(params, class_tile=5120):
    """One-time parameter prep (hoisted out of the forward path):
      * stack [wc1; wc2] into one (H+S, C) weight and pre-add bc1+bc2 (matmul
        / bias fusion),
      * pad the class dim to a multiple of the class tile, cast the streamed
        weight to bf16,
      * reshape small biases to broadcastable 2-D."""
    H = params["w_in"].shape[1]
    L = params["rw1"].shape[0]
    S = params["wc2"].shape[0]
    num_classes = params["wc1"].shape[1]
    out_pad = _round_up(num_classes, class_tile)
    pad = out_pad - num_classes

    w_fused = jnp.concatenate([params["wc1"], params["wc2"]], axis=0)   # (H+S, C)
    w_fused = jnp.pad(w_fused, ((0, 0), (0, pad))).astype(jnp.bfloat16)
    b_fused = jnp.pad(params["bc1"] + params["bc2"], ((0, pad),))
    b_fused = b_fused.reshape(1, out_pad).astype(jnp.float32)

    return dict(
        w_in=params["w_in"],
        b_in=params["b_in"].reshape(1, H),
        rw1=params["rw1"], rb1=params["rb1"].reshape(L, 1, H),
        rw2=params["rw2"], rb2=params["rb2"].reshape(L, 1, H),
        w_cls=w_fused, b_cls=b_fused,
        class_tile=class_tile, num_classes=num_classes, sat_dim=S,
    )


# ----------------------------------------------------------------------------
# Forward (sat_only=False path):  out = SINR_Net(enc) + sent2_to_classes(sent2_enc)
# ----------------------------------------------------------------------------
def sasi_lf_forward(enc, sent2_enc, prep, *, trim=True):
    B, input_len = enc.shape
    H = prep["w_in"].shape[1]
    L = prep["rw1"].shape[0]
    S = prep["sat_dim"]
    K = H + S
    out_pad = prep["w_cls"].shape[1]
    TN = prep["class_tile"]
    num_classes = prep["num_classes"]

    # Batch tiling: multiple of 8 (sublane), capped at 256.
    TB = min(256, _round_up(B, 8))
    B_pad = _round_up(B, TB)
    if B_pad != B:
        enc = jnp.pad(enc, ((0, B_pad - B), (0, 0)))
        sent2_enc = jnp.pad(sent2_enc, ((0, B_pad - B), (0, 0)))

    # ---- Kernel 1: hidden state h (bf16), once per batch tile --------------
    enc_kernel = partial(_sinr_hidden_kernel, n_layers=L, input_len=input_len)
    h16 = pl.pallas_call(
        enc_kernel,
        out_shape=jax.ShapeDtypeStruct((B_pad, H), jnp.bfloat16),
        grid_spec=pltpu.PrefetchScalarGridSpec(
            num_scalar_prefetch=0,
            grid=(B_pad // TB,),
            in_specs=[
                pl.BlockSpec((TB, input_len), lambda i: (i, 0)),   # enc
                pl.BlockSpec((input_len, H),  lambda i: (0, 0)),   # w_in
                pl.BlockSpec((1, H),          lambda i: (0, 0)),   # b_in
                pl.BlockSpec((L, H, H),       lambda i: (0, 0, 0)),  # rw1
                pl.BlockSpec((L, 1, H),       lambda i: (0, 0, 0)),  # rb1
                pl.BlockSpec((L, H, H),       lambda i: (0, 0, 0)),  # rw2
                pl.BlockSpec((L, 1, H),       lambda i: (0, 0, 0)),  # rb2
            ],
            out_specs=pl.BlockSpec((TB, H), lambda i: (i, 0)),
        ),
        compiler_params=pltpu.CompilerParams(
            dimension_semantics=("parallel",)),
    )(enc, prep["w_in"], prep["b_in"],
      prep["rw1"], prep["rb1"], prep["rw2"], prep["rb2"])

    # Late-fusion features: [h | sent2_enc] in bf16 (tiny B x (H+S) concat).
    feat = jnp.concatenate([h16, sent2_enc.astype(jnp.bfloat16)], axis=-1)

    # ---- Kernel 2: fused classifier over class tiles ------------------------
    nj = out_pad // TN          # class tiles (outer, "parallel")
    ni = B_pad // TB            # batch tiles (inner, "parallel")
    flops = 2 * B_pad * out_pad * K
    # Class-major grid: fused weight/bias stream once total; only the tiny
    # feature tile is re-fetched per class tile.
    bytes_accessed = (prep["w_cls"].size * 2 + out_pad * 4
                      + B_pad * out_pad * 4
                      + nj * B_pad * K * 2)

    out = pl.pallas_call(
        _classifier_kernel,
        out_shape=jax.ShapeDtypeStruct((B_pad, out_pad), jnp.float32),
        grid_spec=pltpu.PrefetchScalarGridSpec(
            num_scalar_prefetch=0,
            grid=(nj, ni),
            in_specs=[
                pl.BlockSpec((TB, K), lambda j, i: (i, 0)),   # [h | sent2] bf16
                pl.BlockSpec((K, TN), lambda j, i: (0, j)),   # fused weight bf16
                pl.BlockSpec((1, TN), lambda j, i: (0, j)),   # fused bias f32
            ],
            out_specs=pl.BlockSpec((TB, TN), lambda j, i: (i, j)),
        ),
        compiler_params=pltpu.CompilerParams(
            dimension_semantics=("parallel", "parallel"),
            vmem_limit_bytes=48 * 1024 * 1024,
        ),
        cost_estimate=pl.CostEstimate(flops=int(flops), transcendentals=0,
                                      bytes_accessed=int(bytes_accessed)),
    )(feat, prep["w_cls"], prep["b_cls"])

    if not trim:
        return out              # (B_pad, out_pad); consumer slices/masks
    if out_pad != num_classes:
        out = out[:, :num_classes]
    if B_pad != B:
        out = out[:B]
    return out


# ----------------------------------------------------------------------------
# Pure-JAX reference mirroring the kernel's precision choices
# (f32 encoder/residuals, bf16 classifier inputs/weights, f32 accumulation).
# ----------------------------------------------------------------------------
def sasi_lf_forward_ref(enc, sent2_enc, params):
    h = jnp.maximum(enc @ params["w_in"] + params["b_in"], 0.0)
    for l in range(params["rw1"].shape[0]):
        t = jnp.maximum(h @ params["rw1"][l] + params["rb1"][l], 0.0)
        t = jnp.maximum(t @ params["rw2"][l] + params["rb2"][l], 0.0)
        h = h + t
    sinr = jnp.dot(h.astype(jnp.bfloat16),
                   params["wc1"].astype(jnp.bfloat16),
                   preferred_element_type=jnp.float32)
    sat = jnp.dot(sent2_enc.astype(jnp.bfloat16),
                  params["wc2"].astype(jnp.bfloat16),
                  preferred_element_type=jnp.float32)
    return sinr + params["bc1"] + sat + params["bc2"]


if __name__ == "__main__":
    INPUT_LEN = 4      # 'loc' predictors only
    HIDDEN = 32        # small hidden for the test (module default is 256)
    LAYERS = 4
    NUM_CLASSES = 10040
    SAT_DIM = 256
    BATCH = 8

    key = jax.random.PRNGKey(0)
    k_enc, k_sat, k_p = jax.random.split(key, 3)
    enc = jax.random.normal(k_enc, (BATCH, INPUT_LEN), jnp.float32)
    sent2_enc = jax.random.normal(k_sat, (BATCH, SAT_DIM), jnp.float32)

    params = init_params(k_p, INPUT_LEN, HIDDEN, LAYERS, NUM_CLASSES, SAT_DIM)
    prep = prepare_params(params, class_tile=5120)   # one-time, off the hot path

    out = sasi_lf_forward(enc, sent2_enc, prep)
    out = jax.block_until_ready(out)

    ref = sasi_lf_forward_ref(enc, sent2_enc, params)
    assert out.shape == (BATCH, NUM_CLASSES), out.shape
    max_err = float(jnp.max(jnp.abs(out - ref)))
    assert jnp.allclose(out, ref, atol=1e-2, rtol=1e-2), max_err

    print("KERNEL_OK")
</pallas_src>

<mosaic_0001>
module attributes {stable_mosaic.version = 11 : i64} {
  func.func @_sinr_hidden_kernel(%arg0: i32, %arg1: memref<8x4xf32, #tpu.memory_space<vmem>>, %arg2: memref<4x32xf32, #tpu.memory_space<vmem>>, %arg3: memref<1x32xf32, #tpu.memory_space<vmem>>, %arg4: memref<4x32x32xf32, #tpu.memory_space<vmem>>, %arg5: memref<4x1x32xf32, #tpu.memory_space<vmem>>, %arg6: memref<4x32x32xf32, #tpu.memory_space<vmem>>, %arg7: memref<4x1x32xf32, #tpu.memory_space<vmem>>, %arg8: memref<8x32xbf16, #tpu.memory_space<vmem>>) attributes {dimension_semantics = [#tpu.dimension_semantics<parallel>], iteration_bounds = array<i64: 1>, scalar_prefetch = 0 : i64, scratch_operands = 0 : i64, tpu.core_type = #tpu.core_type<tc>, window_params = [{transform_indices = @transform_0, window_bounds = array<i64: 8, 4>}, {pipeline_mode = #tpu.pipeline_mode<synchronous>, transform_indices = @transform_1, window_bounds = array<i64: 4, 32>}, {pipeline_mode = #tpu.pipeline_mode<synchronous>, transform_indices = @transform_2, window_bounds = array<i64: 1, 32>}, {pipeline_mode = #tpu.pipeline_mode<synchronous>, transform_indices = @transform_3, window_bounds = array<i64: 4, 32, 32>}, {pipeline_mode = #tpu.pipeline_mode<synchronous>, transform_indices = @transform_4, window_bounds = array<i64: 4, 1, 32>}, {pipeline_mode = #tpu.pipeline_mode<synchronous>, transform_indices = @transform_5, window_bounds = array<i64: 4, 32, 32>}, {pipeline_mode = #tpu.pipeline_mode<synchronous>, transform_indices = @transform_6, window_bounds = array<i64: 4, 1, 32>}, {transform_indices = @transform_7, window_bounds = array<i64: 8, 32>}]} {
    %c0 = arith.constant 0 : index
    %c0_0 = arith.constant 0 : index
    %0 = vector.load %arg1[%c0, %c0_0] : memref<8x4xf32, #tpu.memory_space<vmem>>, vector<8x4xf32>
    %c0_1 = arith.constant 0 : index
    %c0_2 = arith.constant 0 : index
    %1 = vector.load %arg2[%c0_1, %c0_2] : memref<4x32xf32, #tpu.memory_space<vmem>>, vector<4x32xf32>
    %2 = vector.extract_strided_slice %0 {offsets = [0, 0], sizes = [8, 1], strides = [1, 1]} : vector<8x4xf32> to vector<8x1xf32>
    %3 = vector.extract_strided_slice %1 {offsets = [0, 0], sizes = [1, 32], strides = [1, 1]} : vector<4x32xf32> to vector<1x32xf32>
    %4 = vector.broadcast %2 : vector<8x1xf32> to vector<8x32xf32>
    %5 = vector.broadcast %3 : vector<1x32xf32> to vector<8x32xf32>
    %6 = arith.mulf %4, %5 : vector<8x32xf32>
    %7 = vector.extract_strided_slice %0 {offsets = [0, 1], sizes = [8, 1], strides = [1, 1]} : vector<8x4xf32> to vector<8x1xf32>
    %8 = vector.extract_strided_slice %1 {offsets = [1, 0], sizes = [1, 32], strides = [1, 1]} : vector<4x32xf32> to vector<1x32xf32>
    %9 = vector.broadcast %7 : vector<8x1xf32> to vector<8x32xf32>
    %10 = vector.broadcast %8 : vector<1x32xf32> to vector<8x32xf32>
    %11 = arith.mulf %9, %10 : vector<8x32xf32>
    %12 = arith.addf %6, %11 : vector<8x32xf32>
    %13 = vector.extract_strided_slice %0 {offsets = [0, 2], sizes = [8, 1], strides = [1, 1]} : vector<8x4xf32> to vector<8x1xf32>
    %14 = vector.extract_strided_slice %1 {offsets = [2, 0], sizes = [1, 32], strides = [1, 1]} : vector<4x32xf32> to vector<1x32xf32>
    %15 = vector.broadcast %13 : vector<8x1xf32> to vector<8x32xf32>
    %16 = vector.broadcast %14 : vector<1x32xf32> to vector<8x32xf32>
    %17 = arith.mulf %15, %16 : vector<8x32xf32>
    %18 = arith.addf %12, %17 : vector<8x32xf32>
    %19 = vector.extract_strided_slice %0 {offsets = [0, 3], sizes = [8, 1], strides = [1, 1]} : vector<8x4xf32> to vector<8x1xf32>
    %20 = vector.extract_strided_slice %1 {offsets = [3, 0], sizes = [1, 32], strides = [1, 1]} : vector<4x32xf32> to vector<1x32xf32>
    %21 = vector.broadcast %19 : vector<8x1xf32> to vector<8x32xf32>
    %22 = vector.broadcast %20 : vector<1x32xf32> to vector<8x32xf32>
    %23 = arith.mulf %21, %22 : vector<8x32xf32>
    %24 = arith.addf %18, %23 : vector<8x32xf32>
    %c0_3 = arith.constant 0 : index
    %c0_4 = arith.constant 0 : index
    %25 = vector.load %arg3[%c0_3, %c0_4] : memref<1x32xf32, #tpu.memory_space<vmem>>, vector<1x32xf32>
    %26 = vector.broadcast %25 : vector<1x32xf32> to vector<8x32xf32>
    %27 = arith.addf %24, %26 : vector<8x32xf32>
    %cst = arith.constant 0.000000e+00 : f32
    %28 = vector.broadcast %cst : f32 to vector<8x32xf32>
    %29 = arith.maximumf %27, %28 : vector<8x32xf32>
    %c0_5 = arith.constant 0 : index
    %c0_6 = arith.constant 0 : index
    %c0_7 = arith.constant 0 : index
    %30 = vector.load %arg4[%c0_5, %c0_6, %c0_7] : memref<4x32x32xf32, #tpu.memory_space<vmem>>, vector<1x32x32xf32>
    %31 = vector.shape_cast %30 : vector<1x32x32xf32> to vector<32x32xf32>
    %cst_8 = arith.constant dense<0.000000e+00> : vector<8x32xf32>
    %32 = tpu.matmul %29, %31, %cst_8 {dimension_numbers = #tpu.dot_dimension_numbers<[1], [0], [0], [1], [0, 0, 1, 1], [], []>} : vector<8x32xf32>, vector<32x32xf32>, vector<8x32xf32> -> vector<8x32xf32>
    %c0_9 = arith.constant 0 : index
    %c0_10 = arith.constant 0 : index
    %c0_11 = arith.constant 0 : index
    %33 = vector.load %arg5[%c0_9, %c0_10, %c0_11] : memref<4x1x32xf32, #tpu.memory_space<vmem>>, vector<1x1x32xf32>
    %34 = vector.shape_cast %33 : vector<1x1x32xf32> to vector<1x32xf32>
    %35 = vector.broadcast %34 : vector<1x32xf32> to vector<8x32xf32>
    %36 = arith.addf %32, %35 : vector<8x32xf32>
    %cst_12 = arith.constant 0.000000e+00 : f32
    %37 = vector.broadcast %cst_12 : f32 to vector<8x32xf32>
    %38 = arith.maximumf %36, %37 : vector<8x32xf32>
    %c0_13 = arith.constant 0 : index
    %c0_14 = arith.constant 0 : index
    %c0_15 = arith.constant 0 : index
    %39 = vector.load %arg6[%c0_13, %c0_14, %c0_15] : memref<4x32x32xf32, #tpu.memory_space<vmem>>, vector<1x32x32xf32>
    %40 = vector.shape_cast %39 : vector<1x32x32xf32> to vector<32x32xf32>
    %cst_16 = arith.constant dense<0.000000e+00> : vector<8x32xf32>
    %41 = tpu.matmul %38, %40, %cst_16 {dimension_numbers = #tpu.dot_dimension_numbers<[1], [0], [0], [1], [0, 0, 1, 1], [], []>} : vector<8x32xf32>, vector<32x32xf32>, vector<8x32xf32> -> vector<8x32xf32>
    %c0_17 = arith.constant 0 : index
    %c0_18 = arith.constant 0 : index
    %c0_19 = arith.constant 0 : index
    %42 = vector.load %arg7[%c0_17, %c0_18, %c0_19] : memref<4x1x32xf32, #tpu.memory_space<vmem>>, vector<1x1x32xf32>
    %43 = vector.shape_cast %42 : vector<1x1x32xf32> to vector<1x32xf32>
    %44 = vector.broadcast %43 : vector<1x32xf32> to vector<8x32xf32>
    %45 = arith.addf %41, %44 : vector<8x32xf32>
    %cst_20 = arith.constant 0.000000e+00 : f32
    %46 = vector.broadcast %cst_20 : f32 to vector<8x32xf32>
    %47 = arith.maximumf %45, %46 : vector<8x32xf32>
    %48 = arith.addf %29, %47 : vector<8x32xf32>
    %c1 = arith.constant 1 : index
    %c0_21 = arith.constant 0 : index
    %c0_22 = arith.constant 0 : index
    %49 = vector.load %arg4[%c1, %c0_21, %c0_22] : memref<4x32x32xf32, #tpu.memory_space<vmem>>, vector<1x32x32xf32>
    %50 = vector.shape_cast %49 : vector<1x32x32xf32> to vector<32x32xf32>
    %cst_23 = arith.constant dense<0.000000e+00> : vector<8x32xf32>
    %51 = tpu.matmul %48, %50, %cst_23 {dimension_numbers = #tpu.dot_dimension_numbers<[1], [0], [0], [1], [0, 0, 1, 1], [], []>} : vector<8x32xf32>, vector<32x32xf32>, vector<8x32xf32> -> vector<8x32xf32>
    %c1_24 = arith.constant 1 : index
    %c0_25 = arith.constant 0 : index
    %c0_26 = arith.constant 0 : index
    %52 = vector.load %arg5[%c1_24, %c0_25, %c0_26] : memref<4x1x32xf32, #tpu.memory_space<vmem>>, vector<1x1x32xf32>
    %53 = vector.shape_cast %52 : vector<1x1x32xf32> to vector<1x32xf32>
    %54 = vector.broadcast %53 : vector<1x32xf32> to vector<8x32xf32>
    %55 = arith.addf %51, %54 : vector<8x32xf32>
    %cst_27 = arith.constant 0.000000e+00 : f32
    %56 = vector.broadcast %cst_27 : f32 to vector<8x32xf32>
    %57 = arith.maximumf %55, %56 : vector<8x32xf32>
    %c1_28 = arith.constant 1 : index
    %c0_29 = arith.constant 0 : index
    %c0_30 = arith.constant 0 : index
    %58 = vector.load %arg6[%c1_28, %c0_29, %c0_30] : memref<4x32x32xf32, #tpu.memory_space<vmem>>, vector<1x32x32xf32>
    %59 = vector.shape_cast %58 : vector<1x32x32xf32> to vector<32x32xf32>
    %cst_31 = arith.constant dense<0.000000e+00> : vector<8x32xf32>
    %60 = tpu.matmul %57, %59, %cst_31 {dimension_numbers = #tpu.dot_dimension_numbers<[1], [0], [0], [1], [0, 0, 1, 1], [], []>} : vector<8x32xf32>, vector<32x32xf32>, vector<8x32xf32> -> vector<8x32xf32>
    %c1_32 = arith.constant 1 : index
    %c0_33 = arith.constant 0 : index
    %c0_34 = arith.constant 0 : index
    %61 = vector.load %arg7[%c1_32, %c0_33, %c0_34] : memref<4x1x32xf32, #tpu.memory_space<vmem>>, vector<1x1x32xf32>
    %62 = vector.shape_cast %61 : vector<1x1x32xf32> to vector<1x32xf32>
    %63 = vector.broadcast %62 : vector<1x32xf32> to vector<8x32xf32>
    %64 = arith.addf %60, %63 : vector<8x32xf32>
    %cst_35 = arith.constant 0.000000e+00 : f32
    %65 = vector.broadcast %cst_35 : f32 to vector<8x32xf32>
    %66 = arith.maximumf %64, %65 : vector<8x32xf32>
    %67 = arith.addf %48, %66 : vector<8x32xf32>
    %c2 = arith.constant 2 : index
    %c0_36 = arith.constant 0 : index
    %c0_37 = arith.constant 0 : index
    %68 = vector.load %arg4[%c2, %c0_36, %c0_37] : memref<4x32x32xf32, #tpu.memory_space<vmem>>, vector<1x32x32xf32>
    %69 = vector.shape_cast %68 : vector<1x32x32xf32> to vector<32x32xf32>
    %cst_38 = arith.constant dense<0.000000e+00> : vector<8x32xf32>
    %70 = tpu.matmul %67, %69, %cst_38 {dimension_numbers = #tpu.dot_dimension_numbers<[1], [0], [0], [1], [0, 0, 1, 1], [], []>} : vector<8x32xf32>, vector<32x32xf32>, vector<8x32xf32> -> vector<8x32xf32>
    %c2_39 = arith.constant 2 : index
    %c0_40 = arith.constant 0 : index
    %c0_41 = arith.constant 0 : index
    %71 = vector.load %arg5[%c2_39, %c0_40, %c0_41] : memref<4x1x32xf32, #tpu.memory_space<vmem>>, vector<1x1x32xf32>
    %72 = vector.shape_cast %71 : vector<1x1x32xf32> to vector<1x32xf32>
    %73 = vector.broadcast %72 : vector<1x32xf32> to vector<8x32xf32>
    %74 = arith.addf %70, %73 : vector<8x32xf32>
    %cst_42 = arith.constant 0.000000e+00 : f32
    %75 = vector.broadcast %cst_42 : f32 to vector<8x32xf32>
    %76 = arith.maximumf %74, %75 : vector<8x32xf32>
    %c2_43 = arith.constant 2 : index
    %c0_44 = arith.constant 0 : index
    %c0_45 = arith.constant 0 : index
    %77 = vector.load %arg6[%c2_43, %c0_44, %c0_45] : memref<4x32x32xf32, #tpu.memory_space<vmem>>, vector<1x32x32xf32>
    %78 = vector.shape_cast %77 : vector<1x32x32xf32> to vector<32x32xf32>
    %cst_46 = arith.constant dense<0.000000e+00> : vector<8x32xf32>
    %79 = tpu.matmul %76, %78, %cst_46 {dimension_numbers = #tpu.dot_dimension_numbers<[1], [0], [0], [1], [0, 0, 1, 1], [], []>} : vector<8x32xf32>, vector<32x32xf32>, vector<8x32xf32> -> vector<8x32xf32>
    %c2_47 = arith.constant 2 : index
    %c0_48 = arith.constant 0 : index
    %c0_49 = arith.constant 0 : index
    %80 = vector.load %arg7[%c2_47, %c0_48, %c0_49] : memref<4x1x32xf32, #tpu.memory_space<vmem>>, vector<1x1x32xf32>
    %81 = vector.shape_cast %80 : vector<1x1x32xf32> to vector<1x32xf32>
    %82 = vector.broadcast %81 : vector<1x32xf32> to vector<8x32xf32>
    %83 = arith.addf %79, %82 : vector<8x32xf32>
    %cst_50 = arith.constant 0.000000e+00 : f32
    %84 = vector.broadcast %cst_50 : f32 to vector<8x32xf32>
    %85 = arith.maximumf %83, %84 : vector<8x32xf32>
    %86 = arith.addf %67, %85 : vector<8x32xf32>
    %c3 = arith.constant 3 : index
    %c0_51 = arith.constant 0 : index
    %c0_52 = arith.constant 0 : index
    %87 = vector.load %arg4[%c3, %c0_51, %c0_52] : memref<4x32x32xf32, #tpu.memory_space<vmem>>, vector<1x32x32xf32>
    %88 = vector.shape_cast %87 : vector<1x32x32xf32> to vector<32x32xf32>
    %cst_53 = arith.constant dense<0.000000e+00> : vector<8x32xf32>
    %89 = tpu.matmul %86, %88, %cst_53 {dimension_numbers = #tpu.dot_dimension_numbers<[1], [0], [0], [1], [0, 0, 1, 1], [], []>} : vector<8x32xf32>, vector<32x32xf32>, vector<8x32xf32> -> vector<8x32xf32>
    %c3_54 = arith.constant 3 : index
    %c0_55 = arith.constant 0 : index
    %c0_56 = arith.constant 0 : index
    %90 = vector.load %arg5[%c3_54, %c0_55, %c0_56] : memref<4x1x32xf32, #tpu.memory_space<vmem>>, vector<1x1x32xf32>
    %91 = vector.shape_cast %90 : vector<1x1x32xf32> to vector<1x32xf32>
    %92 = vector.broadcast %91 : vector<1x32xf32> to vector<8x32xf32>
    %93 = arith.addf %89, %92 : vector<8x32xf32>
    %cst_57 = arith.constant 0.000000e+00 : f32
    %94 = vector.broadcast %cst_57 : f32 to vector<8x32xf32>
    %95 = arith.maximumf %93, %94 : vector<8x32xf32>
    %c3_58 = arith.constant 3 : index
    %c0_59 = arith.constant 0 : index
    %c0_60 = arith.constant 0 : index
    %96 = vector.load %arg6[%c3_58, %c0_59, %c0_60] : memref<4x32x32xf32, #tpu.memory_space<vmem>>, vector<1x32x32xf32>
    %97 = vector.shape_cast %96 : vector<1x32x32xf32> to vector<32x32xf32>
    %cst_61 = arith.constant dense<0.000000e+00> : vector<8x32xf32>
    %98 = tpu.matmul %95, %97, %cst_61 {dimension_numbers = #tpu.dot_dimension_numbers<[1], [0], [0], [1], [0, 0, 1, 1], [], []>} : vector<8x32xf32>, vector<32x32xf32>, vector<8x32xf32> -> vector<8x32xf32>
    %c3_62 = arith.constant 3 : index
    %c0_63 = arith.constant 0 : index
    %c0_64 = arith.constant 0 : index
    %99 = vector.load %arg7[%c3_62, %c0_63, %c0_64] : memref<4x1x32xf32, #tpu.memory_space<vmem>>, vector<1x1x32xf32>
    %100 = vector.shape_cast %99 : vector<1x1x32xf32> to vector<1x32xf32>
    %101 = vector.broadcast %100 : vector<1x32xf32> to vector<8x32xf32>
    %102 = arith.addf %98, %101 : vector<8x32xf32>
    %cst_65 = arith.constant 0.000000e+00 : f32
    %103 = vector.broadcast %cst_65 : f32 to vector<8x32xf32>
    %104 = arith.maximumf %102, %103 : vector<8x32xf32>
    %105 = arith.addf %86, %104 : vector<8x32xf32>
    %106 = arith.truncf %105 : vector<8x32xf32> to vector<8x32xbf16>
    %c0_66 = arith.constant 0 : index
    %c0_67 = arith.constant 0 : index
    %107 = vector.load %arg8[%c0_66, %c0_67] : memref<8x32xbf16, #tpu.memory_space<vmem>>, vector<8x32xbf16>
    tpu.vector_store %arg8[%c0_66, %c0_67], %106 {strides = array<i32>} : memref<8x32xbf16, #tpu.memory_space<vmem>>, vector<8x32xbf16>,
    return
  }
  func.func @transform_0(%arg0: i32) -> (i32, i32) {
    %c0_i32 = arith.constant 0 : i32
    %c0_i32_0 = arith.constant 0 : i32
    return %arg0, %c0_i32 : i32, i32
  }
  func.func @transform_1(%arg0: i32) -> (i32, i32) {
    %c0_i32 = arith.constant 0 : i32
    %c0_i32_0 = arith.constant 0 : i32
    %c0_i32_1 = arith.constant 0 : i32
    return %c0_i32, %c0_i32_0 : i32, i32
  }
  func.func @transform_2(%arg0: i32) -> (i32, i32) {
    %c0_i32 = arith.constant 0 : i32
    %c0_i32_0 = arith.constant 0 : i32
    %c0_i32_1 = arith.constant 0 : i32
    return %c0_i32, %c0_i32_0 : i32, i32
  }
  func.func @transform_3(%arg0: i32) -> (i32, i32, i32) {
    %c0_i32 = arith.constant 0 : i32
    %c0_i32_0 = arith.constant 0 : i32
    %c0_i32_1 = arith.constant 0 : i32
    %c0_i32_2 = arith.constant 0 : i32
    return %c0_i32, %c0_i32_0, %c0_i32_1 : i32, i32, i32
  }
  func.func @transform_4(%arg0: i32) -> (i32, i32, i32) {
    %c0_i32 = arith.constant 0 : i32
    %c0_i32_0 = arith.constant 0 : i32
    %c0_i32_1 = arith.constant 0 : i32
    %c0_i32_2 = arith.constant 0 : i32
    return %c0_i32, %c0_i32_0, %c0_i32_1 : i32, i32, i32
  }
  func.func @transform_5(%arg0: i32) -> (i32, i32, i32) {
    %c0_i32 = arith.constant 0 : i32
    %c0_i32_0 = arith.constant 0 : i32
    %c0_i32_1 = arith.constant 0 : i32
    %c0_i32_2 = arith.constant 0 : i32
    return %c0_i32, %c0_i32_0, %c0_i32_1 : i32, i32, i32
  }
  func.func @transform_6(%arg0: i32) -> (i32, i32, i32) {
    %c0_i32 = arith.constant 0 : i32
    %c0_i32_0 = arith.constant 0 : i32
    %c0_i32_1 = arith.constant 0 : i32
    %c0_i32_2 = arith.constant 0 : i32
    return %c0_i32, %c0_i32_0, %c0_i32_1 : i32, i32, i32
  }
  func.func @transform_7(%arg0: i32) -> (i32, i32) {
    %c0_i32 = arith.constant 0 : i32
    %c0_i32_0 = arith.constant 0 : i32
    return %arg0, %c0_i32 : i32, i32
  }
}

</mosaic_0001>

<bundles_post_ra>
// kernel: tpu_custom_call.1
= control target key start
LH: loop header
LB: loop body
LE: loop exit
PB: predicated region body
PF: predicated region fallthrough
CT: control target
= control target key end

     0   :  { %12 = vsyncpa [#allocation3], 0  ;;  %s1271_s0 = inlined_call_operand.vmem [shape: f32[8,4], index: 0, kind: input, shape index: {}]   ;;  %s1272_s1 = inlined_call_operand.vmem [shape: f32[4,32], index: 1, kind: input, shape index: {}]   ;;  %s1273_s2 = inlined_call_operand.vmem [shape: f32[1,32], index: 2, kind: input, shape index: {}]   ;;  %s1274_s3 = inlined_call_operand.hbm [shape: f32[4,32,32], index: 3, kind: input, shape index: {}]   ;;  %s1275_s4 = inlined_call_operand.vmem [shape: f32[4,1,32], index: 4, kind: input, shape index: {}]   ;;  %s1276_s5 = inlined_call_operand.hbm [shape: f32[4,32,32], index: 5, kind: input, shape index: {}]   ;;  %s1277_s6 = inlined_call_operand.vmem [shape: f32[4,1,32], index: 6, kind: input, shape index: {}]   ;;  %s1278_s7 = inlined_call_operand.hbm [shape: bf16[8,32], index: 7, kind: output, shape index: {}]  }
   0x1   :  { %13 = vsyncpa [#allocation6], 0 }
   0x2   :  { %14 = vsyncpa [#allocation4], 0  ;;  %s1110_s24 = smov [#allocation2]   ;;  %s1038_s28 = scalar_lea.hbm %s1274_s3, 2048 }
   0x3   :  { %s26_s25 = sshll.u32 %s1110_s24, 4  ;;  %p1039_p0 = scmp.ne.s32.totalorder %s1274_s3, %s1038_s28  ;;  %s27_s25 = int_to_ptr.vmem [resolvable:$true] %s26_s25 }
   0x4   :  { %p1042_p1 = scmp.lt.u32.totalorder %s1038_s28, %s1274_s3 }
   0x6   :  { %p1044_p2 = pnand %p1042_p1, %p1039_p0 }
   0x8   :  { %1047 = shalt.err (!%p1044_p2)
}
   0x9   :  { %s1048_s10 = scalar_lea.vmem %s27_s25, 2048  ;;  %p1053_p4 = scmp.lt.s32.totalorder %s27_s25, %s27_s25 }
   0xa   :  { %p1049_p3 = scmp.ne.s32.totalorder %s27_s25, %s1048_s10  ;;  %p1054_p5 = scmp.lt.s32.totalorder %s1048_s10, %s1048_s10 }
   0xc   :  { %p1055_p6 = por %p1054_p5, %p1053_p4 }
   0xe   :  { %p1056_p7 = pnand %p1055_p6, %p1049_p3 }
  0x10   :  { %1059 = shalt.err (!%p1056_p7)
}
  0x11   :  { %s1111_s11 = smov 128   ;;  %s1112_s12 = smov 8  }
  0x12   :  { %32 = dma.hbm_to_vmem [thread:$0]  %s1274_s3, 2048, %s27_s25, [#allocation3], %s1111_s11, %s1111_s11, %s1112_s12  }
  0x13   :  { %s1113_s15 = smov [#allocation5]   ;;  %s1060_s19 = scalar_lea.hbm %s1276_s5, 2048 }
  0x14   :  { %s40_s16 = sshll.u32 %s1113_s15, 4  ;;  %p1061_p8 = scmp.ne.s32.totalorder %s1276_s5, %s1060_s19  ;;  %s41_s16 = int_to_ptr.vmem [resolvable:$true] %s40_s16 }
  0x15   :  { %p1064_p9 = scmp.lt.u32.totalorder %s1060_s19, %s1276_s5 }
  0x17   :  { %p1066_p10 = pnand %p1064_p9, %p1061_p8 }
  0x19   :  { %1069 = shalt.err (!%p1066_p10)
}
  0x1a   :  { %s1070_s24 = scalar_lea.vmem %s41_s16, 2048  ;;  %p1075_p12 = scmp.lt.s32.totalorder %s41_s16, %s41_s16 }
  0x1b   :  { %p1071_p11 = scmp.ne.s32.totalorder %s41_s16, %s1070_s24  ;;  %p1076_p13 = scmp.lt.s32.totalorder %s1070_s24, %s1070_s24 }
  0x1d   :  { %p1077_p0 = por %p1076_p13, %p1075_p12 }
  0x1f   :  { %p1078_p1 = pnand %p1077_p0, %p1071_p11 }
  0x21   :  { %1081 = shalt.err (!%p1078_p1)
}
  0x22   :  { %46 = dma.hbm_to_vmem [thread:$0]  %s1276_s5, 2048, %s41_s16, [#allocation6], %s1111_s11, %s1111_s11, %s1112_s12  }
  0x23   :  { %1104 = dma.done.wait [#allocation3], 2048  }
  0x24   :  { %1105 = vsyncadd [#allocation3], 4294965248 }
  0x25   :  { %1106 = dma.done.wait [#allocation6], 2048  }
  0x26   :  { %1107 = vsyncadd [#allocation6], 4294965248  ;;  %v1114_v0 = vmov 0   ;;  %v1115_v1 = vmov 2   ;;  %v55_v2 = vld [vmem:[%s1271_s0] sm:$0xff]  ;;  %v1116_v3 = vmov 1   ;;  %v62_v16 = vlaneseq }
  0x27   :  { %1033 = vset.pattern.permute.xlu0 %v1114_v0  ;;  %1035 = vset.pattern.permute.xlu1 %v1115_v1  ;;  %v1117_v4 = vmov 3   ;;  %v106_v5 = vld [vmem:[#allocation2] sm:$0xff]  ;;  %v107_v6 = vld [vmem:[#allocation2 + $0x8] sm:$0xff]  ;;  %v1118_v8 = vmov 0.0|0.0   ;;  %v108_v9 = vld [vmem:[#allocation2 + $0x10] sm:$0xff]  ;;  %vm1119_vm0 = vmmov 0  }
  0x28   :  { %59 = vperm.xlu0 %1033, %v55_v2   ;;  %78 = vperm.xlu1 %1035, %v55_v2   ;;  %v974_v7 = vpack.c.bf16 %v107_v6, %v106_v5  ;;  %v109_v10 = vld [vmem:[#allocation2 + $0x18] sm:$0xff]  ;;  %v1120_v12 = vmov 0.0   ;;  %v192_v13 = vld [vmem:[#allocation5] sm:$0xff]  ;;  %v193_v14 = vld [vmem:[#allocation5 + $0x8] sm:$0xff]  ;;  %v63_v17 = vshrl.u32 %v62_v16, 7  ;;  %vm117_vm1 = vcmask 261120  }
  0x29   :  { %973 = vmatprep.subr.bf16.mxu0 %v1118_v8  ;;  %979 = vmatprep.subr.bf16.mxu1 %v1118_v8  ;;  %v977_v11 = vpack.c.bf16 %v109_v10, %v108_v9  ;;  %v980_v15 = vpack.c.bf16 %v193_v14, %v192_v13  ;;  %v56_v20 = vld [vmem:[%s1272_s1] sm:$0xf]  ;;  %v194_v41 = vld [vmem:[#allocation5 + $0x10] sm:$0xff]  ;;  %v195_v42 = vld [vmem:[#allocation5 + $0x18] sm:$0xff]  ;;  %s1121_s21 = smov [#allocation7]   ;;  %vm804_vm2 = vcmask 257024  }
  0x2a   :  { %975 = vmatpush3.bf16.msra.mxu0 %v974_v7  ;;  %893 = vmatprep.mubr.msk.f32.mxu0 %vm1119_vm0, %v1120_v12  ;;  %v64_v18 = vsub.s32 0, %v63_v17  ;;  %v73_v19 = vsub.s32 1, %v63_v17  ;;  %v83_v22 = vsub.s32 2, %v63_v17  ;;  %v93_v24 = vsub.s32 3, %v63_v17  ;;  %v822_v37 = vld [vmem:[%s1273_s2] ss:$0 sm:$0xff] }
  0x2b   :  { %976 = vmatprep.subr.bf16.mxu0 %v1118_v8  ;;  %904 = vmatprep.mubr.msk.f32.mxu1 %vm1119_vm0, %v1120_v12  ;;  %v983_v43 = vpack.c.bf16 %v195_v42, %v194_v41  ;;  %v823_v44 = vld [vmem:[%s1275_s4] ss:$0 sm:$0xff]  ;;  %v280_v50 = vld [vmem:[#allocation2 + $0x28] sm:$0xff]  ;;  %v281_v52 = vld [vmem:[#allocation2 + $0x30] sm:$0xff]  ;;  %s812_s22 = sshll.u32 %s1121_s21, 4  ;;  %s813_s22 = int_to_ptr.vmem [resolvable:$true] %s812_s22 }
  0x2c   :  { %1034 = vset.pattern.permute.xlu0 %v1116_v3  ;;  %1036 = vset.pattern.permute.xlu1 %v1117_v4  ;;  %v65_v25 = vrot.slane %v56_v20, %v64_v18  ;;  %v74_v26 = vrot.slane %v56_v20, %v73_v19  ;;  %v84_v27 = vrot.slane %v56_v20, %v83_v22  ;;  %v279_v49 = vld [vmem:[#allocation2 + $0x20] sm:$0xff]  ;;  %v282_v53 = vld [vmem:[#allocation2 + $0x38] sm:$0xff]  ;;  %v367_v56 = vld [vmem:[#allocation5 + $0x28] sm:$0xff]  ;;  %p1087_p3 = scmp.lt.s32.totalorder %s813_s22, %s813_s22 }
  0x2d   :  { %68 = vperm.xlu0 %1034, %v55_v2   ;;  %88 = vperm.xlu1 %1036, %v55_v2   ;;  %v94_v28 = vrot.slane %v56_v20, %v93_v24  ;;  %v986_v51 = vpack.c.bf16 %v280_v50, %v279_v49  ;;  %v989_v54 = vpack.c.bf16 %v282_v53, %v281_v52  ;;  %v366_v55 = vld [vmem:[#allocation5 + $0x20] sm:$0xff]  ;;  %v368_v0 = vld [vmem:[#allocation5 + $0x30] sm:$0xff]  ;;  %v369_v1 = vld [vmem:[#allocation5 + $0x38] sm:$0xff] }
  0x2e   :  { %978 = vmatpush3.bf16.msra.mxu0 %v977_v11  ;;  %981 = vmatpush3.bf16.msra.mxu1 %v980_v15  ;;  %v992_v57 = vpack.c.bf16 %v367_v56, %v366_v55  ;;  %v825_v58 = vld [vmem:[%s1277_s6] ss:$0 sm:$0xff]  ;;  %v995_v2 = vpack.c.bf16 %v369_v1, %v368_v0  ;;  %v828_v3 = vld [vmem:[%s1275_s4 + $0x1] ss:$0 sm:$0xff]  ;;  %v455_v10 = vld [vmem:[#allocation2 + $0x48] sm:$0xff] }
  0x2f   :  { %985 = vmatprep.subr.bf16.mxu0 %v1118_v8  ;;  %982 = vmatprep.subr.bf16.mxu1 %v1118_v8  ;;  %v454_v9 = vld [vmem:[#allocation2 + $0x40] sm:$0xff]  ;;  %v456_v13 = vld [vmem:[#allocation2 + $0x50] sm:$0xff]  ;;  %v457_v14 = vld [vmem:[#allocation2 + $0x58] sm:$0xff] }
  0x30   :  { %v998_v11 = vpack.c.bf16 %v455_v10, %v454_v9  ;;  %v1001_v15 = vpack.c.bf16 %v457_v14, %v456_v13  ;;  %v541_v16 = vld [vmem:[#allocation5 + $0x40] sm:$0xff]  ;;  %v542_v17 = vld [vmem:[#allocation5 + $0x48] sm:$0xff] }
  0x31   :  { %1037 = vset.pattern.permute.xlu0 %v1117_v4  ;;  %v1004_v18 = vpack.c.bf16 %v542_v17, %v541_v16  ;;  %v831_v19 = vld [vmem:[%s1277_s6 + $0x1] ss:$0 sm:$0xff]  ;;  %v840_v50 = vld [vmem:[%s1275_s4 + $0x3] ss:$0 sm:$0xff] }
  0x32   :  { %984 = vmatpush3.bf16.msra.mxu1 %v983_v43 }
  0x33   :  { %991 = vmatprep.subr.bf16.mxu1 %v1118_v8 }
  0xa7   :  { %v60_v21 = vpop.permute.xlu0 %59  ;;  %v79_v23 = vpop.permute.xlu1 %78 }
  0xa8   :  { %v66_v31 = vmul.f32 %v65_v25, %v60_v21  ;;  %v85_v33 = vmul.f32 %v84_v27, %v79_v23  ;;  %v543_v25 = vld [vmem:[#allocation5 + $0x50] sm:$0xff] }
  0xac   :  { %v69_v29 = vpop.permute.xlu0 %68  ;;  %v89_v30 = vpop.permute.xlu1 %88 }
  0xad   :  { %v75_v32 = vmul.f32 %v74_v26, %v69_v29  ;;  %v95_v35 = vmul.f32 %v94_v28, %v89_v30  ;;  %v544_v26 = vld [vmem:[#allocation5 + $0x58] sm:$0xff]  ;;  %v834_v28 = vld [vmem:[%s1275_s4 + $0x2] ss:$0 sm:$0xff]  ;;  %s1082_s4 = scalar_lea.vmem %s813_s22, 64 }
  0xae   :  { %v1007_v27 = vpack.c.bf16 %v544_v26, %v543_v25  ;;  %p1083_p2 = scmp.ne.s32.totalorder %s813_s22, %s1082_s4  ;;  %p1088_p4 = scmp.lt.s32.totalorder %s1082_s4, %s1082_s4 }
  0xaf   :  { %v76_v34 = vadd.f32 %v75_v32, %v66_v31 }
  0xb0   :  { %p1089_p5 = por %p1088_p4, %p1087_p3 }
  0xb1   :  { %v86_v36 = vadd.f32 %v85_v33, %v76_v34  ;;  %v629_v33 = vld [vmem:[#allocation2 + $0x60] sm:$0xff]  ;;  %v630_v34 = vld [vmem:[#allocation2 + $0x68] sm:$0xff] }
  0xb2   :  { %p1090_p6 = pnand %p1089_p5, %p1083_p2 }
  0xb3   :  { %v96_v38 = vadd.f32 %v95_v35, %v86_v36  ;;  %v1010_v35 = vpack.c.bf16 %v630_v34, %v629_v33  ;;  %v631_v36 = vld [vmem:[#allocation2 + $0x70] sm:$0xff] }
  0xb5   :  { %v104_v39 = vadd.f32 %v822_v37, %v96_v38  ;;  %v632_v37 = vld [vmem:[#allocation2 + $0x78] sm:$0xff] }
  0xb6   :  { %v1013_v38 = vpack.c.bf16 %v632_v37, %v631_v36 }
  0xb7   :  { %v105_v40 = vmax.f32 %v104_v39, 0.0  ;;  %v716_v39 = vld [vmem:[#allocation5 + $0x60] sm:$0xff] }
  0xb9   :  { %894 = vmatmul.mubr.msk.f32.vlgmr.msra.gmra.mrb[0].mxu0 %vm117_vm1, %v105_v40 }
  0xba   :  { %915 = vmatprep.mubr.msk.f32.mxu0 %vm1119_vm0, %v1120_v12  ;;  %987 = vmatpush3.bf16.msra.mxu0 %v986_v51 }
  0xbb   :  { %988 = vmatprep.subr.bf16.mxu0 %v1118_v8 }
  0xbe   :  { %990 = vmatpush3.bf16.msra.mxu0 %v989_v54  ;;  %v843_v54 = vld [vmem:[%s1277_s6 + $0x3] ss:$0 sm:$0xff] }
  0xbf   :  { %997 = vmatprep.subr.bf16.mxu0 %v1118_v8 }
 0x18c   :  { %v187_v45 = vpop.f32.mrb[0].mxu0 }
 0x18d   :  { %v188_v46 = vadd.f32 %v823_v44, %v187_v45  ;;  %v895_v47 = vpop.f32.mrb[1].mxu0 }
 0x18e   :  { %v718_v47 = vld [vmem:[#allocation5 + $0x70] sm:$0xff] }
 0x18f   :  { %v191_v48 = vmax.f32 %v188_v46, 0.0 }
 0x191   :  { %905 = vmatmul.mubr.msk.f32.vlgmr.msra.gmra.mrb[0].mxu1 %vm117_vm1, %v191_v48  ;;  %v719_v48 = vld [vmem:[#allocation5 + $0x78] sm:$0xff] }
 0x192   :  { %926 = vmatprep.mubr.msk.f32.mxu1 %vm1119_vm0, %v1120_v12  ;;  %993 = vmatpush3.bf16.msra.mxu1 %v992_v57  ;;  %v1019_v49 = vpack.c.bf16 %v719_v48, %v718_v47 }
 0x193   :  { %994 = vmatprep.subr.bf16.mxu1 %v1118_v8 }
 0x196   :  { %996 = vmatpush3.bf16.msra.mxu1 %v995_v2 }
 0x197   :  { %1003 = vmatprep.subr.bf16.mxu1 %v1118_v8 }
 0x264   :  { %v272_v59 = vpop.f32.mrb[0].mxu1 }
 0x265   :  { %v273_v60 = vadd.f32 %v825_v58, %v272_v59  ;;  %v906_v61 = vpop.f32.mrb[1].mxu1 }
 0x267   :  { %v276_v62 = vmax.f32 %v273_v60, 0.0 }
 0x269   :  { %v277_v63 = vadd.f32 %v276_v62, %v105_v40  ;;  %v717_v40 = vld [vmem:[#allocation5 + $0x68] sm:$0xff] }
 0x26a   :  { %v1016_v41 = vpack.c.bf16 %v717_v40, %v716_v39 }
 0x26b   :  { %916 = vmatmul.mubr.msk.f32.vlgmr.msra.gmra.mrb[2].mxu0 %vm117_vm1, %v277_v63 }
 0x26c   :  { %937 = vmatprep.mubr.msk.f32.mxu0 %vm1119_vm0, %v1120_v12  ;;  %999 = vmatpush3.bf16.msra.mxu0 %v998_v11 }
 0x26d   :  { %1000 = vmatprep.subr.bf16.mxu0 %v1118_v8 }
 0x270   :  { %1002 = vmatpush3.bf16.msra.mxu0 %v1001_v15 }
 0x271   :  { %1009 = vmatprep.subr.bf16.mxu0 %v1118_v8 }
 0x33e   :  { %v360_v4 = vpop.f32.mrb[2].mxu0 }
 0x33f   :  { %v361_v5 = vadd.f32 %v828_v3, %v360_v4  ;;  %v917_v6 = vpop.f32.mrb[3].mxu0 }
 0x341   :  { %v364_v7 = vmax.f32 %v361_v5, 0.0 }
 0x343   :  { %927 = vmatmul.mubr.msk.f32.vlgmr.msra.gmra.mrb[2].mxu1 %vm117_vm1, %v364_v7 }
 0x344   :  { %948 = vmatprep.mubr.msk.f32.mxu1 %vm1119_vm0, %v1120_v12  ;;  %1005 = vmatpush3.bf16.msra.mxu1 %v1004_v18 }
 0x345   :  { %1006 = vmatprep.subr.bf16.mxu1 %v1118_v8 }
 0x348   :  { %1008 = vmatpush3.bf16.msra.mxu1 %v1007_v27 }
 0x349   :  { %1015 = vmatprep.subr.bf16.mxu1 %v1118_v8 }
 0x416   :  { %v447_v20 = vpop.f32.mrb[2].mxu1 }
 0x417   :  { %v448_v21 = vadd.f32 %v831_v19, %v447_v20  ;;  %v928_v22 = vpop.f32.mrb[3].mxu1 }
 0x419   :  { %v451_v23 = vmax.f32 %v448_v21, 0.0 }
 0x41b   :  { %v452_v24 = vadd.f32 %v451_v23, %v277_v63 }
 0x41d   :  { %938 = vmatmul.mubr.msk.f32.vlgmr.msra.gmra.mrb[4].mxu0 %vm117_vm1, %v452_v24 }
 0x41e   :  { %959 = vmatprep.mubr.msk.f32.mxu0 %vm1119_vm0, %v1120_v12  ;;  %1011 = vmatpush3.bf16.msra.mxu0 %v1010_v35 }
 0x41f   :  { %1012 = vmatprep.subr.bf16.mxu0 %v1118_v8 }
 0x422   :  { %1014 = vmatpush3.bf16.msra.mxu0 %v1013_v38 }
 0x4f0   :  { %v535_v29 = vpop.f32.mrb[4].mxu0 }
 0x4f1   :  { %v536_v30 = vadd.f32 %v834_v28, %v535_v29  ;;  %v939_v31 = vpop.f32.mrb[5].mxu0 }
 0x4f3   :  { %v539_v32 = vmax.f32 %v536_v30, 0.0 }
 0x4f5   :  { %949 = vmatmul.mubr.msk.f32.vlgmr.msra.gmra.mrb[4].mxu1 %vm117_vm1, %v539_v32 }
 0x4f6   :  { %970 = vmatprep.mubr.msk.f32.mxu1 %vm1119_vm0, %v1120_v12  ;;  %1017 = vmatpush3.bf16.msra.mxu1 %v1016_v41  ;;  %v837_v12 = vld [vmem:[%s1277_s6 + $0x2] ss:$0 sm:$0xff] }
 0x4f7   :  { %1018 = vmatprep.subr.bf16.mxu1 %v1118_v8 }
 0x4fa   :  { %1020 = vmatpush3.bf16.msra.mxu1 %v1019_v49 }
 0x5c8   :  { %v622_v42 = vpop.f32.mrb[4].mxu1 }
 0x5c9   :  { %v623_v43 = vadd.f32 %v837_v12, %v622_v42  ;;  %v950_v44 = vpop.f32.mrb[5].mxu1 }
 0x5cb   :  { %v626_v45 = vmax.f32 %v623_v43, 0.0 }
 0x5cd   :  { %v627_v46 = vadd.f32 %v626_v45, %v452_v24 }
 0x5cf   :  { %960 = vmatmul.mubr.msk.f32.vlgmr.msra.gmra.mrb[6].mxu0 %vm117_vm1, %v627_v46 }
 0x6a2   :  { %v710_v8 = vpop.f32.mrb[6].mxu0 }
 0x6a3   :  { %v711_v51 = vadd.f32 %v840_v50, %v710_v8  ;;  %v961_v52 = vpop.f32.mrb[7].mxu0 }
 0x6a5   :  { %v714_v53 = vmax.f32 %v711_v51, 0.0 }
 0x6a7   :  { %971 = vmatmul.mubr.msk.f32.vlgmr.msra.gmra.mrb[6].mxu1 %vm117_vm1, %v714_v53 }
 0x77a   :  { %v797_v55 = vpop.f32.mrb[6].mxu1 }
 0x77b   :  { %v798_v56 = vadd.f32 %v843_v54, %v797_v55  ;;  %v972_v57 = vpop.f32.mrb[7].mxu1 }
 0x77d   :  { %v801_v58 = vmax.f32 %v798_v56, 0.0 }
 0x77f   :  { %v802_v59 = vadd.f32 %v801_v58, %v627_v46 }
 0x781   :  { %v803_v60 = vpack.c.bf16 %v802_v59, %v802_v59 }
 0x783   :  { %805 = vst.msk [vmem:[#allocation7] sm:$0xf] %vm804_vm2, %v803_v60 }
 0x784   :  { %1093 = shalt.err (!%p1090_p6)
}
 0x785   :  { %s1094_s24 = scalar_lea.hbm %s1278_s7, 64 }
 0x786   :  { %p1095_p7 = scmp.ne.s32.totalorder %s1278_s7, %s1094_s24  ;;  %p1098_p8 = scmp.lt.u32.totalorder %s1094_s24, %s1278_s7 }
 0x788   :  { %p1100_p9 = pnand %p1098_p8, %p1095_p7 }
 0x78a   :  { %1103 = shalt.err (!%p1100_p9)
}
 0x78b   :  { %815 = dma.vmem_to_hbm [thread:$0]  %s813_s22, 64, %s1278_s7, [#allocation4]  }
 0x78c   :  { %1108 = dma.done.wait [#allocation4], 64  }
 0x78d   :  { %1109 = vsyncadd [#allocation4], 4294967232 }
 0x78e   :  { %819 = vsyncpa [#allocation3], 1 }
 0x78f   :  { %820 = vsyncpa [#allocation6], 1 }
 0x790   :  { %821 = vsyncpa [#allocation4], 1 }

</bundles_post_ra>
